<compile_context>
chip_gen: v5e
topology: v5e:2x2
jax: 0.10.0
libtpu: 0.0.40
codegen_flags: <defaults>
</compile_context>

<pallas_src>
import functools
import math

import jax
import jax.numpy as jnp
from jax.experimental import pallas as pl
from jax.experimental.pallas import tpu as pltpu  # noqa: F401  (kept per template)

# Model config (small, consistent with the module: hidden % heads == 0)
NUM_HEADS = 4
HIDDEN = 32
HEAD_SIZE = HIDDEN // NUM_HEADS
BATCH = 2
SEQ = 8


def _self_attention_kernel(x_ref, w_ref, b_ref, hmask_ref, bsum_ref, o_ref, *,
                           num_heads):
    """Single invocation, everything resident in VMEM.

    x_ref    : (B, S, 3H)  lane-concatenated [q_in | k_in | v_in]
    w_ref    : (3H, 3H)    block-diag [Wq*scale, Wk, Wv] (scale folded host-side)
    b_ref    : (1, 3H)     [bq*scale | bk | bv]
    hmask_ref: (nH*S, H)   head mask: 1 where row-head == column-head
    bsum_ref : (nH*S, nH*S) block-diagonal ones (per-head-block sum matrix)
    o_ref    : (B, S, H)   context_layer
    """
    B, S, H3 = x_ref.shape
    H = H3 // 3
    nH = num_heads
    BS = B * S
    J = nH * S                       # blocked score width, lane j = h*S + k

    # ---- fused QKV projection: one MXU pass + one bias add ------------------
    x2 = x_ref[...].reshape(BS, H3)                       # leading-dim merge only
    qkv = jnp.dot(x2, w_ref[...],
                  preferred_element_type=jnp.float32) + b_ref[...]   # (BS, 3H)

    q = qkv[:, 0 * H:1 * H].reshape(B, S, H)
    k = qkv[:, 1 * H:2 * H].reshape(B, S, H)
    v = qkv[:, 2 * H:3 * H].reshape(B, S, H)

    # ---- head-batched attention (block-mask formulation) --------------------
    hmask = hmask_ref[...]                                 # (J, H)
    k_big = jnp.concatenate([k] * nH, axis=1) * hmask      # (B, J, H), sublane tile
    v_big = jnp.concatenate([v] * nH, axis=1) * hmask      # (B, J, H)

    # scores[b, q, h*S+k] = <Q_head_h[b,q,:], K_head_h[b,k,:]>   (scale folded)
    scores = jnp.einsum('bqc,bjc->bqj', q, k_big,
                        preferred_element_type=jnp.float32)          # (B, S, J)

    # Softmax over k within each head block.  Per-(b,q) global max is a valid
    # shift (softmax is shift invariant per block); avoids segmented lane max.
    scores = scores - jnp.max(scores, axis=-1, keepdims=True)
    p = jnp.exp(scores).reshape(BS, J)

    # Per-block sums broadcast to every lane of the block via one tiny matmul
    # with a constant block-ones matrix (MXU is idle here anyway).
    denom = jnp.dot(p, bsum_ref[...], preferred_element_type=jnp.float32)

    # EUP reciprocal (separate bundle slot) instead of a VALU divide.
    probs = (p * pl.reciprocal(denom, approx=True)).reshape(B, S, J)
    # TODO(synk): dropout(p=0.1) omitted — eval-mode identity.  Training mode
    # would use pltpu.prng_seed + pltpu.stateful_bernoulli on `probs`.

    # ctx[b, q, h*hd+d] = sum_k probs[b,q,h*S+k] * V[b,k,h*hd+d]
    ctx = jnp.einsum('bqj,bjc->bqc', probs, v_big,
                     preferred_element_type=jnp.float32)              # (B, S, H)

    # Heads land lane-contiguously (h*hd+d), matching PyTorch's permute+view
    # layout -> single full-width store, no output concat.
    o_ref[...] = ctx.astype(o_ref.dtype)


def prepare_qkv_params(wq, bq, wk, bk, wv, bv):
    """One-time host-side weight prep: fused block-diagonal (3H,3H) weight and
    (1,3H) bias, with 1/sqrt(head_size) folded into the Q projection."""
    H = wq.shape[0]
    scale = 1.0 / math.sqrt(HEAD_SIZE)
    w = jnp.zeros((3 * H, 3 * H), jnp.float32)
    w = w.at[0:H, 0:H].set(wq * scale)
    w = w.at[H:2 * H, H:2 * H].set(wk)
    w = w.at[2 * H:3 * H, 2 * H:3 * H].set(wv)
    b = jnp.concatenate([bq * scale, bk, bv], axis=-1)   # (1, 3H)
    return w, b


def self_attention(q_in, k_in, v_in, w_qkv, b_qkv):
    B, S, H = q_in.shape
    assert H == HIDDEN
    J = NUM_HEADS * S

    # XLA-side (outside the kernel) fusion of the three inputs -> one DMA.
    x_qkv = jnp.concatenate([q_in, k_in, v_in], axis=-1)            # (B, S, 3H)

    # Constant masks built host/XLA-side (not re-derived in-kernel).
    jj = jnp.arange(J)
    cc = jnp.arange(H)
    head_mask = (jj[:, None] // S == cc[None, :] // HEAD_SIZE).astype(jnp.float32)
    blk_ones = (jj[:, None] // S == jj[None, :] // S).astype(jnp.float32)

    kernel = functools.partial(_self_attention_kernel, num_heads=NUM_HEADS)

    # Gridless call: whole problem resident in VMEM (few tens of KiB), default
    # whole-array blocks — no 1-step pipeline prologue/epilogue, no per-step
    # grid overhead, no cross-core sharding at this tiny size.
    return pl.pallas_call(
        kernel,
        out_shape=jax.ShapeDtypeStruct((B, S, H), jnp.float32),
    )(x_qkv, w_qkv, b_qkv, head_mask, blk_ones)


def _reference(q_in, k_in, v_in, wq, bq, wk, bk, wv, bv):
    # Pure-JAX reference mirroring the PyTorch forward (eval mode, mask=None).
    B, S, H = q_in.shape
    Q = q_in @ wq + bq
    K = k_in @ wk + bk
    V = v_in @ wv + bv

    def split(x):  # (B,S,H) -> (B, nH, S, hd)
        return x.reshape(B, S, NUM_HEADS, HEAD_SIZE).transpose(0, 2, 1, 3)

    Qh, Kh, Vh = split(Q), split(K), split(V)
    scores = jnp.einsum('bhqd,bhkd->bhqk', Qh, Kh) / math.sqrt(HEAD_SIZE)
    probs = jax.nn.softmax(scores, axis=-1)
    ctx = jnp.einsum('bhqk,bhkd->bhqd', probs, Vh)
    return ctx.transpose(0, 2, 1, 3).reshape(B, S, H)


if __name__ == "__main__":
    key = jax.random.PRNGKey(0)
    k_qin, k_kin, k_vin, k_wq, k_wk, k_wv, k_bq, k_bk, k_bv = jax.random.split(key, 9)

    q_in = jax.random.normal(k_qin, (BATCH, SEQ, HIDDEN), dtype=jnp.float32)
    k_in = jax.random.normal(k_kin, (BATCH, SEQ, HIDDEN), dtype=jnp.float32)
    v_in = jax.random.normal(k_vin, (BATCH, SEQ, HIDDEN), dtype=jnp.float32)

    # "nn.Linear"-like deterministic init; weights stored as (in, out) ==
    # torch_weight.T, biases as (1, H).
    bound = 1.0 / math.sqrt(HIDDEN)
    wq = jax.random.uniform(k_wq, (HIDDEN, HIDDEN), jnp.float32, -bound, bound)
    wk = jax.random.uniform(k_wk, (HIDDEN, HIDDEN), jnp.float32, -bound, bound)
    wv = jax.random.uniform(k_wv, (HIDDEN, HIDDEN), jnp.float32, -bound, bound)
    bq = jax.random.uniform(k_bq, (1, HIDDEN), jnp.float32, -bound, bound)
    bk = jax.random.uniform(k_bk, (1, HIDDEN), jnp.float32, -bound, bound)
    bv = jax.random.uniform(k_bv, (1, HIDDEN), jnp.float32, -bound, bound)

    # One-time host-side fusion of the three Linear layers (+ scale fold).
    w_qkv, b_qkv = prepare_qkv_params(wq, bq, wk, bk, wv, bv)
    w_qkv, b_qkv = jax.block_until_ready((w_qkv, b_qkv))

    out = self_attention(q_in, k_in, v_in, w_qkv, b_qkv)
    out = jax.block_until_ready(out)

    ref = _reference(q_in, k_in, v_in, wq, bq, wk, bk, wv, bv)
    assert out.shape == (BATCH, SEQ, HIDDEN)
    # Tolerance loosened vs 1e-5 because the kernel uses the EUP approximate
    # reciprocal for the softmax denominator (per perf review).
    assert jnp.allclose(out, ref, atol=5e-3, rtol=5e-3), "mismatch vs JAX reference"

    print("KERNEL_OK")
</pallas_src>

<mosaic_0001>
module attributes {stable_mosaic.version = 11 : i64} {
  func.func @_self_attention_kernel(%arg0: memref<2x8x96xf32, #tpu.memory_space<vmem>>, %arg1: memref<96x96xf32, #tpu.memory_space<vmem>>, %arg2: memref<1x96xf32, #tpu.memory_space<vmem>>, %arg3: memref<32x32xf32, #tpu.memory_space<vmem>>, %arg4: memref<32x32xf32, #tpu.memory_space<vmem>>, %arg5: memref<2x8x32xf32, #tpu.memory_space<vmem>>) attributes {dimension_semantics = [], scalar_prefetch = 0 : i64, scratch_operands = 0 : i64, tpu.core_type = #tpu.core_type<tc>} {
    %c0 = arith.constant 0 : index
    %c0_0 = arith.constant 0 : index
    %c0_1 = arith.constant 0 : index
    %0 = vector.load %arg0[%c0, %c0_0, %c0_1] : memref<2x8x96xf32, #tpu.memory_space<vmem>>, vector<2x8x96xf32>
    %1 = vector.shape_cast %0 : vector<2x8x96xf32> to vector<16x96xf32>
    %c0_2 = arith.constant 0 : index
    %c0_3 = arith.constant 0 : index
    %2 = vector.load %arg1[%c0_2, %c0_3] : memref<96x96xf32, #tpu.memory_space<vmem>>, vector<96x96xf32>
    %cst = arith.constant dense<0.000000e+00> : vector<16x96xf32>
    %3 = tpu.matmul %1, %2, %cst {dimension_numbers = #tpu.dot_dimension_numbers<[1], [0], [0], [1], [0, 0, 1, 1], [], []>} : vector<16x96xf32>, vector<96x96xf32>, vector<16x96xf32> -> vector<16x96xf32>
    %c0_4 = arith.constant 0 : index
    %c0_5 = arith.constant 0 : index
    %4 = vector.load %arg2[%c0_4, %c0_5] : memref<1x96xf32, #tpu.memory_space<vmem>>, vector<1x96xf32>
    %5 = vector.broadcast %4 : vector<1x96xf32> to vector<16x96xf32>
    %6 = arith.addf %3, %5 : vector<16x96xf32>
    %7 = vector.extract_strided_slice %6 {offsets = [0, 0], sizes = [16, 32], strides = [1, 1]} : vector<16x96xf32> to vector<16x32xf32>
    %8 = vector.shape_cast %7 : vector<16x32xf32> to vector<2x8x32xf32>
    %9 = vector.extract_strided_slice %6 {offsets = [0, 32], sizes = [16, 32], strides = [1, 1]} : vector<16x96xf32> to vector<16x32xf32>
    %10 = vector.shape_cast %9 : vector<16x32xf32> to vector<2x8x32xf32>
    %11 = vector.extract_strided_slice %6 {offsets = [0, 64], sizes = [16, 32], strides = [1, 1]} : vector<16x96xf32> to vector<16x32xf32>
    %12 = vector.shape_cast %11 : vector<16x32xf32> to vector<2x8x32xf32>
    %c0_6 = arith.constant 0 : index
    %c0_7 = arith.constant 0 : index
    %13 = vector.load %arg3[%c0_6, %c0_7] : memref<32x32xf32, #tpu.memory_space<vmem>>, vector<32x32xf32>
    %14 = tpu.concatenate %10, %10, %10, %10 in 1 : vector<2x8x32xf32>, vector<2x8x32xf32>, vector<2x8x32xf32>, vector<2x8x32xf32> -> vector<2x32x32xf32>
    %15 = vector.shape_cast %13 : vector<32x32xf32> to vector<1x32x32xf32>
    %16 = vector.broadcast %15 : vector<1x32x32xf32> to vector<2x32x32xf32>
    %17 = arith.mulf %14, %16 : vector<2x32x32xf32>
    %18 = tpu.concatenate %12, %12, %12, %12 in 1 : vector<2x8x32xf32>, vector<2x8x32xf32>, vector<2x8x32xf32>, vector<2x8x32xf32> -> vector<2x32x32xf32>
    %19 = vector.shape_cast %13 : vector<32x32xf32> to vector<1x32x32xf32>
    %20 = vector.broadcast %19 : vector<1x32x32xf32> to vector<2x32x32xf32>
    %21 = arith.mulf %18, %20 : vector<2x32x32xf32>
    "tpu.trace_start"() <{level = 10 : i32, message = "bqc,bjc->bqj"}> : () -> ()
    %cst_8 = arith.constant dense<0.000000e+00> : vector<2x8x32xf32>
    %22 = tpu.matmul %8, %17, %cst_8 {dimension_numbers = #tpu.dot_dimension_numbers<[2], [2], [1], [1], [0, 0, 0, 1, 1, 1], [0], [0]>} : vector<2x8x32xf32>, vector<2x32x32xf32>, vector<2x8x32xf32> -> vector<2x8x32xf32>
    "tpu.trace_stop"() : () -> ()
    %cst_9 = arith.constant dense<0xFF800000> : vector<2x8xf32>
    %23 = vector.multi_reduction <maximumf>, %22, %cst_9 [2] : vector<2x8x32xf32> to vector<2x8xf32>
    %24 = vector.shape_cast %23 : vector<2x8xf32> to vector<2x8x1xf32>
    %25 = vector.broadcast %24 : vector<2x8x1xf32> to vector<2x8x32xf32>
    %26 = arith.subf %22, %25 : vector<2x8x32xf32>
    %27 = math.exp %26 : vector<2x8x32xf32>
    %28 = vector.shape_cast %27 : vector<2x8x32xf32> to vector<16x32xf32>
    %c0_10 = arith.constant 0 : index
    %c0_11 = arith.constant 0 : index
    %29 = vector.load %arg4[%c0_10, %c0_11] : memref<32x32xf32, #tpu.memory_space<vmem>>, vector<32x32xf32>
    %cst_12 = arith.constant dense<0.000000e+00> : vector<16x32xf32>
    %30 = tpu.matmul %28, %29, %cst_12 {dimension_numbers = #tpu.dot_dimension_numbers<[1], [0], [0], [1], [0, 0, 1, 1], [], []>} : vector<16x32xf32>, vector<32x32xf32>, vector<16x32xf32> -> vector<16x32xf32>
    %31 = tpu.reciprocal %30 {approx = true} : vector<16x32xf32> -> vector<16x32xf32>
    %32 = arith.mulf %28, %31 : vector<16x32xf32>
    %33 = vector.shape_cast %32 : vector<16x32xf32> to vector<2x8x32xf32>
    "tpu.trace_start"() <{level = 10 : i32, message = "bqj,bjc->bqc"}> : () -> ()
    %cst_13 = arith.constant dense<0.000000e+00> : vector<2x8x32xf32>
    %34 = tpu.matmul %33, %21, %cst_13 {dimension_numbers = #tpu.dot_dimension_numbers<[2], [1], [1], [2], [0, 0, 0, 1, 1, 2], [0], [0]>} : vector<2x8x32xf32>, vector<2x32x32xf32>, vector<2x8x32xf32> -> vector<2x8x32xf32>
    "tpu.trace_stop"() : () -> ()
    %c0_14 = arith.constant 0 : index
    %c0_15 = arith.constant 0 : index
    %c0_16 = arith.constant 0 : index
    %35 = vector.load %arg5[%c0_14, %c0_15, %c0_16] : memref<2x8x32xf32, #tpu.memory_space<vmem>>, vector<2x8x32xf32>
    tpu.vector_store %arg5[%c0_14, %c0_15, %c0_16], %34 {strides = array<i32>} : memref<2x8x32xf32, #tpu.memory_space<vmem>>, vector<2x8x32xf32>,
    return
  }
}

</mosaic_0001>

<bundles_post_ra>
// kernel: tpu_custom_call.1
= control target key start
LH: loop header
LB: loop body
LE: loop exit
PB: predicated region body
PF: predicated region fallthrough
CT: control target
= control target key end

     0   :  { %10 = vsyncpa [#allocation3], 0  ;;  %s721_s0 = inlined_call_operand.hbm [shape: f32[2,8,96], index: 0, kind: input, shape index: {}]   ;;  %s722_s1 = inlined_call_operand.hbm [shape: f32[96,96], index: 1, kind: input, shape index: {}]   ;;  %s723_s2 = inlined_call_operand.vmem [shape: f32[1,96], index: 2, kind: input, shape index: {}]   ;;  %s724_s3 = inlined_call_operand.hbm [shape: f32[32,32], index: 3, kind: input, shape index: {}]   ;;  %s725_s4 = inlined_call_operand.hbm [shape: f32[32,32], index: 4, kind: input, shape index: {}]   ;;  %s726_s5 = inlined_call_operand.hbm [shape: f32[2,8,32], index: 5, kind: output, shape index: {}]  }
   0x1   :  { %11 = vsyncpa [#allocation6], 0 }
   0x2   :  { %12 = vsyncpa [#allocation9], 0 }
   0x3   :  { %13 = vsyncpa [#allocation4], 0  ;;  %s31_s20 = sshll.u32 %s722_s1, 4  ;;  %s600_s21 = smov [#allocation5]   ;;  %s32_s20 = int_to_ptr.hbm [resolvable:$true] %s31_s20 }
   0x4   :  { %s33_s22 = sshll.u32 %s600_s21, 4  ;;  %s18_s25 = sshll.u32 %s721_s0, 4  ;;  %s34_s22 = int_to_ptr.vmem [resolvable:$true] %s33_s22  ;;  %s19_s25 = int_to_ptr.hbm [resolvable:$true] %s18_s25 }
   0x5   :  { %s601_s26 = smov 128   ;;  %s602_s27 = smov 8  }
   0x6   :  { %39 = dma.hbm_to_vmem [thread:$0]  %s32_s20, 1536, %s34_s22, [#allocation6], %s601_s26, %s601_s26, %s602_s27  }
   0x7   :  { %s603_s28 = smov [#allocation2]   ;;  %s46_s1 = sshll.u32 %s724_s3, 4  ;;  %s47_s1 = int_to_ptr.hbm [resolvable:$true] %s46_s1 }
   0x8   :  { %s20_s29 = sshll.u32 %s603_s28, 4  ;;  %s59_s8 = sshll.u32 %s725_s4, 4  ;;  %s21_s29 = int_to_ptr.vmem [resolvable:$true] %s20_s29  ;;  %s60_s8 = int_to_ptr.hbm [resolvable:$true] %s59_s8 }
   0x9   :  { %26 = dma.hbm_to_vmem [thread:$0]  %s19_s25, 256, %s21_s29, [#allocation3], %s601_s26, %s601_s26, %s602_s27  }
   0xa   :  { %s604_s9 = smov [#allocation7]   ;;  %s605_s11 = smov [#allocation8]  }
   0xb   :  { %s48_s10 = sshll.u32 %s604_s9, 4  ;;  %s61_s3 = sshll.u32 %s605_s11, 4  ;;  %s49_s10 = int_to_ptr.vmem [resolvable:$true] %s48_s10  ;;  %s62_s3 = int_to_ptr.vmem [resolvable:$true] %s61_s3 }
   0xc   :  { %54 = dma.hbm_to_vmem [thread:$0]  %s47_s1, 512, %s49_s10, [#allocation6], %s601_s26, %s601_s26, %s602_s27  }
   0xd   :  { %67 = dma.hbm_to_vmem [thread:$0]  %s60_s8, 512, %s62_s3, [#allocation9], %s601_s26, %s601_s26, %s602_s27  }
   0xe   :  { %592 = dma.done.wait [#allocation3], 256  }
   0xf   :  { %593 = vsyncadd [#allocation3], 4294967040 }
  0x10   :  { %594 = dma.done.wait [#allocation6], 2048  }
  0x11   :  { %595 = vsyncadd [#allocation6], 4294965248 }
  0x12   :  { %596 = dma.done.wait [#allocation9], 512  }
  0x13   :  { %597 = vsyncadd [#allocation9], 4294966784  ;;  %v97_v0 = vld [vmem:[#allocation5 + $0x58] sm:$0xff]  ;;  %v96_v1 = vld [vmem:[#allocation5 + $0x50] sm:$0xff]  ;;  %s606_s4 = smov 32   ;;  %vm102_vm0 = vcmask 785408  }
  0x14   :  { %113 = vmatpush.msra.mxu0 %v97_v0  ;;  %v95_v2 = vld [vmem:[#allocation5 + $0x48] sm:$0xff]  ;;  %v94_v3 = vld [vmem:[#allocation5 + $0x40] sm:$0xff]  ;;  %v135_v4 = vld [vmem:[#allocation7 + $0x18] sm:$0xff]  ;;  %s607_s14 = smov 96   ;;  %vm192_vm1 = vcmask 261120   ;;  %s609_s15 = smov [#allocation10]  }
  0x15   :  { %v133_v5 = vld [vmem:[#allocation7 + $0x8] sm:$0xff]  ;;  %146 = vrot.lane.b32.xlu0 %v135_v4, %s606_s4  ;;  %v93_v6 = vld [vmem:[#allocation5 + $0x38] sm:$0xff]  ;;  %v92_v7 = vld [vmem:[#allocation5 + $0x30] sm:$0xff]  ;;  %s400_s16 = sshll.u32 %s609_s15, 4  ;;  %s402_s19 = sshll.u32 %s726_s5, 4  ;;  %s401_s16 = int_to_ptr.vmem [resolvable:$true] %s400_s16  ;;  %s403_s19 = int_to_ptr.hbm [resolvable:$true] %s402_s19 }
  0x16   :  { %114 = vmatpush.msra.mxu0 %v96_v1  ;;  %142 = vrot.lane.b32.xlu1 %v133_v5, %s606_s4  ;;  %v91_v8 = vld [vmem:[#allocation5 + $0x28] sm:$0xff]  ;;  %v134_v9 = vld [vmem:[#allocation7 + $0x10] sm:$0xff]  ;;  %v132_v10 = vld [vmem:[#allocation7] sm:$0xff] }
  0x17   :  { %v90_v11 = vld [vmem:[#allocation5 + $0x20] sm:$0xff]  ;;  %v89_v12 = vld [vmem:[#allocation5 + $0x18] sm:$0xff]  ;;  %v88_v13 = vld [vmem:[#allocation5 + $0x10] sm:$0xff] }
  0x18   :  { %115 = vmatpush.msra.mxu0 %v95_v2  ;;  %v87_v14 = vld [vmem:[#allocation5 + $0x8] sm:$0xff]  ;;  %v86_v15 = vld [vmem:[#allocation5] sm:$0xff]  ;;  %v84_v16 = vld [vmem:[#allocation2] sm:$0xff] }
  0x19   :  { %v85_v17 = vld [vmem:[#allocation2 + $0x8] sm:$0xff]  ;;  %v463_v19 = vld [vmem:[%s723_s2] ss:$0 sm:$0xff]  ;;  %s608_s2 = smov 64  }
  0x1a   :  { %116 = vmatpush.msra.mxu0 %v94_v3 }
  0x1c   :  { %117 = vmatpush.msra.mxu0 %v93_v6  ;;  %v281_v6 = vld [vmem:[#allocation8 + $0x10] sm:$0xff] }
  0x1d   :  { %144 = vrot.lane.b32.xlu0 %v134_v9, %s606_s4 }
  0x1e   :  { %118 = vmatpush.msra.mxu0 %v92_v7  ;;  %140 = vrot.lane.b32.xlu1 %v132_v10, %s606_s4  ;;  %v280_v7 = vld [vmem:[#allocation8 + $0x8] sm:$0xff] }
  0x20   :  { %119 = vmatpush.msra.mxu0 %v91_v8  ;;  %v279_v8 = vld [vmem:[#allocation8] sm:$0xff] }
  0x22   :  { %120 = vmatpush.msra.mxu0 %v90_v11 }
  0x24   :  { %121 = vmatpush.msra.mxu0 %v89_v12 }
  0x26   :  { %122 = vmatpush.msra.mxu0 %v88_v13 }
  0x28   :  { %123 = vmatpush.msra.mxu0 %v87_v14 }
  0x2a   :  { %124 = vmatpush.msra.mxu0 %v86_v15 }
  0x2b   :  { %417 = vmatmul.msk.f32.vlgmr.msra.gmra.mxu0 %vm102_vm0, %v84_v16 }
  0x33   :  { %418 = vmatmul.msk.f32.gmra.mxu0 %vm102_vm0, %v85_v17 }
  0x87   :  { %v147_v18 = vpop.permute.xlu0 %146 }
  0x88   :  { %v143_v25 = vpop.permute.xlu1 %142 }
  0x8f   :  { %v145_v21 = vpop.permute.xlu0 %144 }
  0x90   :  { %v141_v31 = vpop.permute.xlu1 %140 }
  0xa8   :  { %v126_v20 = vpop.f32.mrf.mxu0 }
  0xa9   :  { %v667_v22 = vadd.f32 %v463_v19, %v126_v20 }
  0xab   :  { %v154_v23 = vmul.f32 %v145_v21, %v667_v22  ;;  %v155_v24 = vmul.f32 %v147_v18, %v667_v22  ;;  %v152_v32 = vmul.f32 %v141_v31, %v667_v22  ;;  %v153_v33 = vmul.f32 %v143_v25, %v667_v22 }
  0xad   :  { %190 = vrot.lane.b32.xlu2 %v155_v24, %s607_s14  ;;  %188 = vrot.lane.b32.xlu0 %v154_v23, %s607_s14 }
  0xb0   :  { %v129_v26 = vpop.f32.mrf.mxu0 }
  0xb1   :  { %v671_v27 = vadd.f32 %v463_v19, %v129_v26 }
  0xb3   :  { %v158_v28 = vmul.f32 %v145_v21, %v671_v27  ;;  %v159_v29 = vmul.f32 %v147_v18, %v671_v27  ;;  %v157_v30 = vmul.f32 %v143_v25, %v671_v27  ;;  %v156_v34 = vmul.f32 %v141_v31, %v671_v27 }
  0xb5   :  { %232 = vrot.lane.b32.xlu1 %v158_v28, %s607_s14  ;;  %234 = vrot.lane.b32.xlu2 %v159_v29, %s607_s14 }
  0xb6   :  { %230 = vrot.lane.b32.xlu0 %v157_v30, %s607_s14 }
  0xbd   :  { %186 = vrot.lane.b32.xlu2 %v153_v33, %s607_s14  ;;  %184 = vrot.lane.b32.xlu1 %v152_v32, %s607_s14 }
  0xc5   :  { %228 = vrot.lane.b32.xlu2 %v156_v34, %s607_s14 }
  0xcd   :  { %166 = vrot.lane.b32.xlu2 %v135_v4, %s608_s2 }
  0xd5   :  { %164 = vrot.lane.b32.xlu2 %v134_v9, %s608_s2 }
  0xdd   :  { %162 = vrot.lane.b32.xlu2 %v133_v5, %s608_s2  ;;  %v282_v5 = vld [vmem:[#allocation8 + $0x18] sm:$0xff] }
  0xde   :  { %301 = vmatpush.msra.mxu3 %v282_v5 }
  0xe0   :  { %302 = vmatpush.msra.mxu3 %v281_v6 }
  0xe2   :  { %303 = vmatpush.msra.mxu3 %v280_v7 }
  0xe4   :  { %304 = vmatpush.msra.mxu3 %v279_v8 }
  0xe5   :  { %160 = vrot.lane.b32.xlu2 %v132_v10, %s608_s2 }
 0x107   :  { %v191_v35 = vpop.permute.xlu2 %190 }
 0x108   :  { %419 = vmatpush.xpose.msk.msra.mxu1 %vm192_vm1, %v191_v35 }
 0x10f   :  { %v235_v36 = vpop.permute.xlu2 %234 }
 0x110   :  { %424 = vmatpush.xpose.msk.msra.mxu2 %vm192_vm1, %v235_v36 }
 0x117   :  { %v187_v37 = vpop.permute.xlu2 %186 }
 0x11f   :  { %v189_v38 = vpop.permute.xlu0 %188  ;;  %v229_v39 = vpop.permute.xlu2 %228 }
 0x120   :  { %420 = vmatpush.xpose.msk.msra.mxu1 %vm192_vm1, %v189_v38 }
 0x124   :  { %421 = vmatpush.xpose.msk.msra.mxu1 %vm192_vm1, %v187_v37 }
 0x127   :  { %v233_v40 = vpop.permute.xlu1 %232  ;;  %v167_v41 = vpop.permute.xlu2 %166 }
 0x128   :  { %425 = vmatpush.xpose.msk.msra.mxu2 %vm192_vm1, %v233_v40  ;;  %v231_v42 = vpop.permute.xlu0 %230  ;;  %v179_v45 = vmul.f32 %v167_v41, %v671_v27  ;;  %v175_v49 = vmul.f32 %v167_v41, %v667_v22 }
 0x12c   :  { %426 = vmatpush.xpose.msk.msra.mxu2 %vm192_vm1, %v231_v42 }
 0x12f   :  { %v165_v43 = vpop.permute.xlu2 %164  ;;  %v185_v44 = vpop.permute.xlu1 %184 }
 0x130   :  { %v178_v46 = vmul.f32 %v165_v43, %v671_v27  ;;  %422 = vmatpush.xpose.msk.msra.mxu1 %vm192_vm1, %v185_v44  ;;  %427 = vmatpush.xpose.msk.msra.mxu2 %vm192_vm1, %v229_v39  ;;  %v174_v3 = vmul.f32 %v165_v43, %v667_v22 }
 0x132   :  { %v443_v47 = vpack.i.bf16 %v178_v46, %v179_v45 }
 0x133   :  { %423 = vmatmul.msk.f32.vlgmr.msra.gmra.mxu1 %vm192_vm1, %v667_v22  ;;  %428 = vmatmul.msk.f32.vlgmr.msra.gmra.mxu2 %vm192_vm1, %v671_v27 }
 0x134   :  { %444 = vrot.lane.b32.xlu2 %v443_v47, %s608_s2 }
 0x137   :  { %v163_v48 = vpop.permute.xlu2 %162 }
 0x138   :  { %v177_v50 = vmul.f32 %v163_v48, %v671_v27  ;;  %v173_v53 = vmul.f32 %v163_v48, %v667_v22 }
 0x13a   :  { %v448_v51 = vpack.i.bf16 %v175_v49, %v177_v50 }
 0x13c   :  { %449 = vrot.lane.b32.xlu2 %v448_v51, %s608_s2 }
 0x13f   :  { %v161_v52 = vpop.permute.xlu2 %160 }
 0x140   :  { %v172_v54 = vmul.f32 %v161_v52, %v667_v22  ;;  %v176_v2 = vmul.f32 %v161_v52, %v671_v27 }
 0x142   :  { %v458_v55 = vpack.i.bf16 %v172_v54, %v173_v53  ;;  %v453_v4 = vpack.i.bf16 %v174_v3, %v176_v2 }
 0x18e   :  { %v445_v56 = vpop.permute.xlu2 %444 }
 0x18f   :  { %v446_v57 = vunpack.i.l.bf16 %v445_v56  ;;  %v447_v58 = vunpack.i.h.bf16 %v445_v56 }
 0x191   :  { %386 = vmatpush.msrb.mxu2 %v446_v57 }
 0x193   :  { %387 = vmatpush.msrb.mxu2 %v447_v58 }
 0x196   :  { %v450_v59 = vpop.permute.xlu2 %449 }
 0x197   :  { %v452_v60 = vunpack.i.h.bf16 %v450_v59  ;;  %v451_v61 = vunpack.i.l.bf16 %v450_v59 }
 0x199   :  { %347 = vmatpush.msrb.mxu1 %v452_v60  ;;  %388 = vmatpush.msrb.mxu2 %v451_v61 }
 0x1b0   :  { %v221_v62 = vpop.f32.mrf.mxu1 }
 0x1b1   :  { %v267_v63 = vsel %vm192_vm1, %v221_v62, -inf }
 0x1b2   :  { %268 = vmax.xlane.f32.xlu0 %v267_v63 }
 0x1b6   :  { %v264_v0 = vpop.f32.mrf.mxu2 }
 0x1b7   :  { %v270_v1 = vsel %vm192_vm1, %v264_v0, -inf }
 0x1b8   :  { %271 = vmax.xlane.f32.xlu1 %v270_v1 }
 0x1c6   :  { %454 = vrot.lane.b32.xlu0 %v453_v4, %s608_s2 }
 0x1d1   :  { %459 = vrot.lane.b32.xlu1 %v458_v55, %s608_s2 }
 0x225   :  { %v269_v9 = vpop.xlane.xlu0 %268 }
 0x226   :  { %v273_v10 = vsub.f32 %v221_v62, %v269_v9 }
 0x228   :  { %v275_v11 = vmul.f32 1.442695, %v273_v10 }
 0x22a   :  { %464 = vpow2.f32 %v275_v11 }
 0x22b   :  { %v272_v12 = vpop.xlane.xlu1 %271 }
 0x22c   :  { %v274_v13 = vsub.f32 %v264_v0, %v272_v12 }
 0x22e   :  { %v277_v14 = vmul.f32 1.442695, %v274_v13 }
 0x230   :  { %v465_v15 = vpop.eup %464  ;;  %466 = vpow2.f32 %v277_v14 }
 0x231   :  { %429 = vmatmul.msk.f32.vlgmr.msra.gmra.mxu3 %vm192_vm1, %v465_v15 }
 0x236   :  { %v467_v16 = vpop.eup %466 }
 0x238   :  { %v455_v17 = vpop.permute.xlu0 %454 }
 0x239   :  { %v457_v18 = vunpack.i.h.bf16 %v455_v17  ;;  %v456_v19 = vunpack.i.l.bf16 %v455_v17  ;;  %430 = vmatmul.msk.f32.gmra.mxu3 %vm192_vm1, %v467_v16 }
 0x23b   :  { %348 = vmatpush.msrb.mxu1 %v457_v18  ;;  %389 = vmatpush.msrb.mxu2 %v456_v19 }
 0x243   :  { %v460_v20 = vpop.permute.xlu1 %459 }
 0x244   :  { %v461_v21 = vunpack.i.l.bf16 %v460_v20  ;;  %v462_v22 = vunpack.i.h.bf16 %v460_v20 }
 0x246   :  { %349 = vmatpush.msrb.mxu1 %v461_v21 }
 0x248   :  { %350 = vmatpush.msrb.mxu1 %v462_v22 }
 0x2b4   :  { %v306_v23 = vpop.f32.mrf.mxu3 }
 0x2b5   :  { %468 = vrcp.f32 %v306_v23 }
 0x2bb   :  { %v469_v24 = vpop.eup %468 }
 0x2bc   :  { %v309_v25 = vpop.f32.mrf.mxu3  ;;  %v314_v26 = vmul.f32 %v469_v24, %v465_v15 }
 0x2bd   :  { %470 = vrcp.f32 %v309_v25 }
 0x2be   :  { %431 = vmatmul.msk.f32.vlgmr.msrb.gmra.mxu1 %vm192_vm1, %v314_v26 }
 0x2c3   :  { %v471_v27 = vpop.eup %470 }
 0x2c4   :  { %v315_v28 = vmul.f32 %v471_v27, %v467_v16 }
 0x2c6   :  { %432 = vmatmul.msk.f32.vlgmr.msrb.gmra.mxu2 %vm192_vm1, %v315_v28 }
 0x33b   :  { %v352_v29 = vpop.f32.mrf.mxu1 }
 0x33c   :  { %394 = vst.msk [vmem:[#allocation10] sm:$0xff] %vm192_vm1, %v352_v29 }
 0x349   :  { %v391_v30 = vpop.f32.mrf.mxu2 }
 0x34a   :  { %395 = vst.msk [vmem:[#allocation10 + $0x8] sm:$0xff] %vm192_vm1, %v391_v30 }
 0x34b   :  { %408 = dma.vmem_to_hbm [thread:$0]  %s401_s16, 256, %s403_s19, [#allocation4], %s601_s26, %s601_s26, %s602_s27  }
 0x34c   :  { %598 = dma.done.wait [#allocation4], 256  }
 0x34d   :  { %599 = vsyncadd [#allocation4], 4294967040 }
 0x34e   :  { %413 = vsyncpa [#allocation3], 1 }
 0x34f   :  { %414 = vsyncpa [#allocation6], 1 }
 0x350   :  { %415 = vsyncpa [#allocation9], 1 }
 0x351   :  { %416 = vsyncpa [#allocation4], 1 }

</bundles_post_ra>
